<compile_context>
chip_gen: v5e
topology: v5e:2x2
jax: 0.10.0
libtpu: 0.0.40
codegen_flags: <defaults>
</compile_context>

<pallas_src>
import functools

import jax
import jax.numpy as jnp
from jax.experimental import pallas as pl
from jax.experimental.pallas import tpu as pltpu


# ------------------------------- Pallas kernel -------------------------------

def _se_kernel(x_ref, w1t_ref, b1_ref, w2_ref, b2_ref, o_ref, *, inv_hw):
    """Fused SE layer for a block of B_blk batch elements.

    x_ref  : (B_blk, C, HWp) activations, native dtype (spatial on lanes)
    w1t_ref: (C, Cr)   fc1.weight transposed
    b1_ref : (1, Cr)   fc1.bias
    w2_ref : (C, Cr)   fc2.weight (PyTorch layout)
    b2_ref : (C, 1)    fc2.bias
    o_ref  : (B_blk, C, HWp) output, native dtype
    """
    x = x_ref[...]                                            # native dtype

    # --- squeeze: global average pool over the spatial (lane) axis.
    # f32 accumulation only; no f32 copy of the whole slab is kept live.
    s = jnp.sum(x, axis=2, keepdims=True, dtype=jnp.float32) * inv_hw  # (Bb,C,1)

    # --- excitation MLP (tiny: VPU/XLU broadcast + reduce, MXU not worth it).
    w1t = w1t_ref[...]                                        # (C, Cr)
    w2 = w2_ref[...]                                          # (C, Cr)
    # fc1: z[b, j] = sum_c s[b, c] * w1t[c, j] + b1[j]
    z = jnp.sum(s * w1t[None, :, :], axis=1, keepdims=True) + b1_ref[...]  # (Bb,1,Cr)
    z = jnp.maximum(z, 0.0)                                   # ReLU
    # fc2: g[b, c] = sum_j w2[c, j] * z[b, j] + b2[c]
    g = jnp.sum(w2[None, :, :] * z, axis=2, keepdims=True) + b2_ref[...]   # (Bb,C,1)
    # sigmoid: exp and (approx) reciprocal both land on the EUP slot.
    g = pl.reciprocal(1.0 + jnp.exp(-g), approx=True)         # (Bb, C, 1) f32

    # --- scale: per-(batch, channel) gate broadcast across the lanes, done in
    # the activation's native dtype (no f32 slab for bf16 inputs).
    o_ref[...] = x * g.astype(o_ref.dtype)


# -------------------------------- wrapper ------------------------------------

def prepare_se_params(w1, b1, w2, b2):
    """One-time parameter prep (hoisted out of the per-call / jitted path)."""
    C = w2.shape[0]
    Cr = w1.shape[0]
    return (jnp.transpose(w1),          # fc1.weight^T : (C, Cr)
            b1.reshape(1, Cr),          # fc1.bias     : (1, Cr)
            w2,                         # fc2.weight   : (C, Cr)
            b2.reshape(C, 1))           # fc2.bias     : (C, 1)


def se_layer(x_nchw, w1t, b1r, w2, b2r, *, b_blk=None):
    """SELayer forward.  x_nchw: (B, C, H, W); params from prepare_se_params."""
    B, C, H, W = x_nchw.shape
    HW = H * W
    Cr = w1t.shape[1]
    dtype = x_nchw.dtype
    itemsize = jnp.dtype(dtype).itemsize

    # Lane-dense spatial axis: pad HW up to a multiple of 128 so loads/stores
    # are full-width (no masked vst.msk on the store-bound scale phase).
    HWp = ((HW + 127) // 128) * 128
    x = x_nchw.reshape(B, C, HW)
    if HWp != HW:
        x = jnp.pad(x, ((0, 0), (0, 0), (0, HWp - HW)))

    # ---- choose how many batch elements per grid step ----------------------
    per_batch_bytes = C * HWp * itemsize
    if b_blk is None:
        target_bytes = 2 << 20                 # ~2 MiB blocks amortize step cost
        b_blk = max(1, min(B, target_bytes // max(per_batch_bytes, 1)))
        # keep >= min(B, 4) grid steps for pipelining / v7x megacore sharding
        min_steps = min(B, 4)
        b_blk = max(1, min(b_blk, B // min_steps))
        # (in + out) x double-buffer must fit comfortably in VMEM (v7x: 64 MiB)
        vmem_budget = 32 << 20
        while b_blk > 1 and 4 * b_blk * per_batch_bytes > vmem_budget:
            b_blk -= 1
    b_blk = int(b_blk)

    n_steps = (B + b_blk - 1) // b_blk
    Bp = n_steps * b_blk
    if Bp != B:
        x = jnp.pad(x, ((0, Bp - B), (0, 0), (0, 0)))

    # Explicit scoped-VMEM limit: covers the double-buffered blocks + weights,
    # stays under v7x's 64 MiB physical, raises v5e's 16 MiB default if needed.
    vmem_limit = int(min(max(5 * b_blk * per_batch_bytes + (4 << 20), 16 << 20),
                         48 << 20))

    kernel = functools.partial(_se_kernel, inv_hw=1.0 / float(HW))

    out = pl.pallas_call(
        kernel,
        out_shape=jax.ShapeDtypeStruct((Bp, C, HWp), dtype),
        grid=(n_steps,),
        in_specs=[
            pl.BlockSpec((b_blk, C, HWp), lambda b: (b, 0, 0)),  # x block
            pl.BlockSpec((C, Cr), lambda b: (0, 0)),             # fc1.weight^T
            pl.BlockSpec((1, Cr), lambda b: (0, 0)),             # fc1.bias
            pl.BlockSpec((C, Cr), lambda b: (0, 0)),             # fc2.weight
            pl.BlockSpec((C, 1), lambda b: (0, 0)),              # fc2.bias
        ],
        out_specs=pl.BlockSpec((b_blk, C, HWp), lambda b: (b, 0, 0)),
        compiler_params=pltpu.CompilerParams(
            dimension_semantics=("parallel",),
            vmem_limit_bytes=vmem_limit),
    )(x, w1t, b1r, w2, b2r)

    if Bp != B or HWp != HW:
        out = out[:B, :, :HW]
    return out.reshape(B, C, H, W)


# --------------------------- pure-JAX reference -------------------------------

def se_layer_ref(x, w1, b1, w2, b2):
    xf = x.astype(jnp.float32)
    s = jnp.mean(xf, axis=(2, 3))                                  # (B, C)
    z = jnp.maximum(s @ w1.T + b1, 0.0)                            # (B, Cr)
    g = jax.nn.sigmoid(z @ w2.T + b2)                              # (B, C)
    return xf * g[:, :, None, None]


# ----------------------------------- main -------------------------------------

if __name__ == "__main__":
    key = jax.random.PRNGKey(0)
    kx, k1, k2, k3, k4, kx2 = jax.random.split(key, 6)

    # ---- case 1: reviewed shape (B=2, C=64, 16x16, f32) --------------------
    B, C, H, W = 2, 64, 16, 16
    reduction = 16
    Cr = C // reduction

    x = jax.random.normal(kx, (B, C, H, W), jnp.float32)

    # PyTorch nn.Linear-style uniform init.
    lim1 = 1.0 / (C ** 0.5)
    w1 = jax.random.uniform(k1, (Cr, C), jnp.float32, -lim1, lim1)   # fc1.weight
    b1 = jax.random.uniform(k2, (Cr,), jnp.float32, -lim1, lim1)     # fc1.bias
    lim2 = 1.0 / (Cr ** 0.5)
    w2 = jax.random.uniform(k3, (C, Cr), jnp.float32, -lim2, lim2)   # fc2.weight
    b2 = jax.random.uniform(k4, (C,), jnp.float32, -lim2, lim2)      # fc2.bias

    params = prepare_se_params(w1, b1, w2, b2)   # hoisted out of the jit path
    se = jax.jit(se_layer)

    out = jax.block_until_ready(se(x, *params))
    ref = se_layer_ref(x, w1, b1, w2, b2)
    assert out.shape == (B, C, H, W), out.shape
    assert bool(jnp.all(jnp.isfinite(out)))
    # tolerance covers the EUP approximate reciprocal used in the sigmoid
    assert bool(jnp.allclose(out.astype(jnp.float32), ref, rtol=2e-2, atol=2e-3)), \
        float(jnp.max(jnp.abs(out.astype(jnp.float32) - ref)))

    # ---- case 2: real SE shape where H*W is NOT a multiple of 128 (7x7),
    # plus multi-batch blocking (B=8 -> B_blk=2, 4 grid steps) ---------------
    B2 = 8
    x2 = jax.random.normal(kx2, (B2, C, 7, 7), jnp.float32)
    out2 = jax.block_until_ready(se(x2, *params))
    ref2 = se_layer_ref(x2, w1, b1, w2, b2)
    assert out2.shape == (B2, C, 7, 7), out2.shape
    assert bool(jnp.allclose(out2.astype(jnp.float32), ref2, rtol=2e-2, atol=2e-3)), \
        float(jnp.max(jnp.abs(out2.astype(jnp.float32) - ref2)))

    # ---- case 3: bf16 activations (native-dtype scale path, f32 squeeze) ---
    xb = x.astype(jnp.bfloat16)
    outb = jax.block_until_ready(se(xb, *params))
    refb = se_layer_ref(xb, w1, b1, w2, b2)
    assert outb.dtype == jnp.bfloat16
    assert bool(jnp.all(jnp.isfinite(outb.astype(jnp.float32))))
    assert bool(jnp.allclose(outb.astype(jnp.float32), refb, rtol=5e-2, atol=5e-2)), \
        float(jnp.max(jnp.abs(outb.astype(jnp.float32) - refb)))

    print("KERNEL_OK")
</pallas_src>

<mosaic_0001>
module attributes {stable_mosaic.version = 11 : i64} {
  func.func @_se_kernel(%arg0: i32, %arg1: memref<1x64x256xf32, #tpu.memory_space<vmem>>, %arg2: memref<64x4xf32, #tpu.memory_space<vmem>>, %arg3: memref<1x4xf32, #tpu.memory_space<vmem>>, %arg4: memref<64x4xf32, #tpu.memory_space<vmem>>, %arg5: memref<64x1xf32, #tpu.memory_space<vmem>>, %arg6: memref<1x64x256xf32, #tpu.memory_space<vmem>>) attributes {dimension_semantics = [#tpu.dimension_semantics<parallel>], iteration_bounds = array<i64: 2>, scalar_prefetch = 0 : i64, scratch_operands = 0 : i64, tpu.core_type = #tpu.core_type<tc>, window_params = [{transform_indices = @transform_0, window_bounds = array<i64: 1, 64, 256>}, {pipeline_mode = #tpu.pipeline_mode<synchronous>, transform_indices = @transform_1, window_bounds = array<i64: 64, 4>}, {pipeline_mode = #tpu.pipeline_mode<synchronous>, transform_indices = @transform_2, window_bounds = array<i64: 1, 4>}, {pipeline_mode = #tpu.pipeline_mode<synchronous>, transform_indices = @transform_3, window_bounds = array<i64: 64, 4>}, {pipeline_mode = #tpu.pipeline_mode<synchronous>, transform_indices = @transform_4, window_bounds = array<i64: 64, 1>}, {transform_indices = @transform_5, window_bounds = array<i64: 1, 64, 256>}]} {
    %c0 = arith.constant 0 : index
    %c0_0 = arith.constant 0 : index
    %c0_1 = arith.constant 0 : index
    %0 = vector.load %arg1[%c0, %c0_0, %c0_1] : memref<1x64x256xf32, #tpu.memory_space<vmem>>, vector<1x64x256xf32>
    %cst = arith.constant dense<0.000000e+00> : vector<1x64xf32>
    %1 = vector.multi_reduction <add>, %0, %cst [2] : vector<1x64x256xf32> to vector<1x64xf32>
    %2 = vector.shape_cast %1 : vector<1x64xf32> to vector<1x64x1xf32>
    %cst_2 = arith.constant 3.906250e-03 : f32
    %3 = vector.broadcast %cst_2 : f32 to vector<1x64x1xf32>
    %4 = arith.mulf %2, %3 : vector<1x64x1xf32>
    %c0_3 = arith.constant 0 : index
    %c0_4 = arith.constant 0 : index
    %5 = vector.load %arg2[%c0_3, %c0_4] : memref<64x4xf32, #tpu.memory_space<vmem>>, vector<64x4xf32>
    %c0_5 = arith.constant 0 : index
    %c0_6 = arith.constant 0 : index
    %6 = vector.load %arg4[%c0_5, %c0_6] : memref<64x4xf32, #tpu.memory_space<vmem>>, vector<64x4xf32>
    %7 = vector.shape_cast %5 : vector<64x4xf32> to vector<1x64x4xf32>
    %8 = vector.broadcast %4 : vector<1x64x1xf32> to vector<1x64x4xf32>
    %9 = arith.mulf %8, %7 : vector<1x64x4xf32>
    %cst_7 = arith.constant dense<0.000000e+00> : vector<1x4xf32>
    %10 = vector.multi_reduction <add>, %9, %cst_7 [1] : vector<1x64x4xf32> to vector<1x4xf32>
    %11 = vector.shape_cast %10 : vector<1x4xf32> to vector<1x1x4xf32>
    %c0_8 = arith.constant 0 : index
    %c0_9 = arith.constant 0 : index
    %12 = vector.load %arg3[%c0_8, %c0_9] : memref<1x4xf32, #tpu.memory_space<vmem>>, vector<1x4xf32>
    %13 = vector.shape_cast %12 : vector<1x4xf32> to vector<1x1x4xf32>
    %14 = arith.addf %11, %13 : vector<1x1x4xf32>
    %cst_10 = arith.constant 0.000000e+00 : f32
    %15 = vector.broadcast %cst_10 : f32 to vector<1x1x4xf32>
    %16 = arith.maximumf %14, %15 : vector<1x1x4xf32>
    %17 = vector.shape_cast %6 : vector<64x4xf32> to vector<1x64x4xf32>
    %18 = vector.broadcast %16 : vector<1x1x4xf32> to vector<1x64x4xf32>
    %19 = arith.mulf %17, %18 : vector<1x64x4xf32>
    %cst_11 = arith.constant dense<0.000000e+00> : vector<1x64xf32>
    %20 = vector.multi_reduction <add>, %19, %cst_11 [2] : vector<1x64x4xf32> to vector<1x64xf32>
    %21 = vector.shape_cast %20 : vector<1x64xf32> to vector<1x64x1xf32>
    %c0_12 = arith.constant 0 : index
    %c0_13 = arith.constant 0 : index
    %22 = vector.load %arg5[%c0_12, %c0_13] : memref<64x1xf32, #tpu.memory_space<vmem>>, vector<64x1xf32>
    %23 = vector.shape_cast %22 : vector<64x1xf32> to vector<1x64x1xf32>
    %24 = arith.addf %21, %23 : vector<1x64x1xf32>
    %cst_14 = arith.constant 0.000000e+00 : f32
    %25 = vector.broadcast %cst_14 : f32 to vector<1x64x1xf32>
    %26 = arith.subf %25, %24 : vector<1x64x1xf32>
    %27 = math.exp %26 : vector<1x64x1xf32>
    %cst_15 = arith.constant 1.000000e+00 : f32
    %28 = vector.broadcast %cst_15 : f32 to vector<1x64x1xf32>
    %29 = arith.addf %28, %27 : vector<1x64x1xf32>
    %30 = tpu.reciprocal %29 {approx = true} : vector<1x64x1xf32> -> vector<1x64x1xf32>
    %31 = vector.broadcast %30 : vector<1x64x1xf32> to vector<1x64x256xf32>
    %32 = arith.mulf %0, %31 : vector<1x64x256xf32>
    %c0_16 = arith.constant 0 : index
    %c0_17 = arith.constant 0 : index
    %c0_18 = arith.constant 0 : index
    %33 = vector.load %arg6[%c0_16, %c0_17, %c0_18] : memref<1x64x256xf32, #tpu.memory_space<vmem>>, vector<1x64x256xf32>
    tpu.vector_store %arg6[%c0_16, %c0_17, %c0_18], %32 {strides = array<i32>} : memref<1x64x256xf32, #tpu.memory_space<vmem>>, vector<1x64x256xf32>,
    return
  }
  func.func @transform_0(%arg0: i32) -> (i32, i32, i32) {
    %c0_i32 = arith.constant 0 : i32
    %c0_i32_0 = arith.constant 0 : i32
    %c0_i32_1 = arith.constant 0 : i32
    return %arg0, %c0_i32, %c0_i32_0 : i32, i32, i32
  }
  func.func @transform_1(%arg0: i32) -> (i32, i32) {
    %c0_i32 = arith.constant 0 : i32
    %c0_i32_0 = arith.constant 0 : i32
    %c0_i32_1 = arith.constant 0 : i32
    return %c0_i32, %c0_i32_0 : i32, i32
  }
  func.func @transform_2(%arg0: i32) -> (i32, i32) {
    %c0_i32 = arith.constant 0 : i32
    %c0_i32_0 = arith.constant 0 : i32
    %c0_i32_1 = arith.constant 0 : i32
    return %c0_i32, %c0_i32_0 : i32, i32
  }
  func.func @transform_3(%arg0: i32) -> (i32, i32) {
    %c0_i32 = arith.constant 0 : i32
    %c0_i32_0 = arith.constant 0 : i32
    %c0_i32_1 = arith.constant 0 : i32
    return %c0_i32, %c0_i32_0 : i32, i32
  }
  func.func @transform_4(%arg0: i32) -> (i32, i32) {
    %c0_i32 = arith.constant 0 : i32
    %c0_i32_0 = arith.constant 0 : i32
    %c0_i32_1 = arith.constant 0 : i32
    return %c0_i32, %c0_i32_0 : i32, i32
  }
  func.func @transform_5(%arg0: i32) -> (i32, i32, i32) {
    %c0_i32 = arith.constant 0 : i32
    %c0_i32_0 = arith.constant 0 : i32
    %c0_i32_1 = arith.constant 0 : i32
    return %arg0, %c0_i32, %c0_i32_0 : i32, i32, i32
  }
}

</mosaic_0001>

<bundles_post_ra>
// kernel: se_layer.1
= control target key start
LH: loop header
LB: loop body
LE: loop exit
PB: predicated region body
PF: predicated region fallthrough
CT: control target
= control target key end

     0   :  { %s634_s18 = smov 0   ;;  %s831_s0 = inlined_call_operand.vmem [shape: f32[2,64,256], index: 0, kind: input, shape index: {}]   ;;  %s832_s1 = inlined_call_operand.vmem [shape: f32[64,4], index: 1, kind: input, shape index: {}]   ;;  %s833_s2 = inlined_call_operand.vmem [shape: f32[1,4], index: 2, kind: input, shape index: {}]   ;;  %s834_s3 = inlined_call_operand.vmem [shape: f32[64,4], index: 3, kind: input, shape index: {}]   ;;  %s835_s4 = inlined_call_operand.vmem [shape: f32[64,1], index: 4, kind: input, shape index: {}]   ;;  %s836_s5 = inlined_call_operand.vmem [shape: f32[2,64,256], index: 5, kind: output, shape index: {}]  }
   0x1 LB: > { %s538_s19 = sadd.s32 4294967295, %s601_s18   ;;  %p542_p0 = scmp.ge.s32.totalorder %s601_s18, 1  ;;  %s601_s18 = sphi %s634_s18, %s15_s18  }
   0x2   : > { %p187_p1 = scmp.lt.s32.totalorder %s601_s18, 3 }
   0x4   : > { %p188_p2 = pnand %p542_p0, %p187_p1 }
   0x5   : > { %p215_p3 = scmp.lt.s32.totalorder (!%p188_p2), %s538_s19, 1 }
   0x6   : > { %191 = sbr.rel (%p188_p2) target bundleno = 458 (0x1ca), region = 40 }
   0xb   : > { %s838_s19 = smov (!%p215_p3, %s538_s19), 1  ;;  %v273_v28 = vld [vmem:[%s832_s1] sm:$0xff]  ;;  %v275_v30 = vld [vmem:[%s832_s1 + $0x10] sm:$0xff]  ;;  %v274_v31 = vld [vmem:[%s832_s1 + $0x8] sm:$0xff]  ;;  %vm297_vm0 = vcmask 31744  }
   0xc   : > { %s549_s20 = sshll.u32 %s838_s19, 7  ;;  %v276_v35 = vld [vmem:[%s832_s1 + $0x18] sm:$0xff]  ;;  %v277_v43 = vld [vmem:[%s832_s1 + $0x20] sm:$0xff]  ;;  %v278_v45 = vld [vmem:[%s832_s1 + $0x28] sm:$0xff] }
   0xd   : > { %s219_s23 = scalar_lea.vmem %s831_s0, %s549_s20  ;;  %v279_v54 = vld [vmem:[%s832_s1 + $0x30] sm:$0xff]  ;;  %v280_v57 = vld [vmem:[%s832_s1 + $0x38] sm:$0xff]  ;;  %s794_s7 = scalar_lea.vmem %s836_s5, %s549_s20 }
   0xe   : > { %v650_v0 = vld [vmem:[%s219_s23] sm:$0xff]  ;;  %v652_v1 = vld [vmem:[%s219_s23 + $0x8] sm:$0xff]  ;;  %v668_v9 = vld [vmem:[%s219_s23 + $0x10] sm:$0xff] }
   0xf   : > { %v654_v2 = vld [vmem:[%s219_s23 + $0x20] sm:$0xff]  ;;  %v241_v3 = vadd.f32 %v652_v1, %v650_v0  ;;  %v658_v4 = vld [vmem:[%s219_s23 + $0x28] sm:$0xff]  ;;  %v670_v10 = vld [vmem:[%s219_s23 + $0x18] sm:$0xff] }
  0x10   : > { %v660_v5 = vld [vmem:[%s219_s23 + $0x40] sm:$0xff]  ;;  %v662_v6 = vld [vmem:[%s219_s23 + $0x48] sm:$0xff]  ;;  %v247_v7 = vadd.f32 %v658_v4, %v654_v2  ;;  %v672_v11 = vld [vmem:[%s219_s23 + $0x30] sm:$0xff]  ;;  %v244_v15 = vadd.f32 %v670_v10, %v668_v9 }
  0x11   : > { %v253_v8 = vadd.f32 %v662_v6, %v660_v5  ;;  %242 = vadd.xlane.f32.xlu0 %v241_v3  ;;  %v674_v12 = vld [vmem:[%s219_s23 + $0x38] sm:$0xff]  ;;  %v676_v13 = vld [vmem:[%s219_s23 + $0x50] sm:$0xff]  ;;  %v686_v18 = vld [vmem:[%s219_s23 + $0x60] sm:$0xff] }
  0x12   : > { %248 = vadd.xlane.f32.xlu1 %v247_v7  ;;  %v678_v14 = vld [vmem:[%s219_s23 + $0x58] sm:$0xff]  ;;  %v250_v16 = vadd.f32 %v674_v12, %v672_v11  ;;  %v688_v19 = vld [vmem:[%s219_s23 + $0x68] sm:$0xff]  ;;  %v690_v20 = vld [vmem:[%s219_s23 + $0x70] sm:$0xff] }
  0x13   : > { %254 = vadd.xlane.f32.xlu2 %v253_v8  ;;  %v256_v17 = vadd.f32 %v678_v14, %v676_v13  ;;  %v692_v21 = vld [vmem:[%s219_s23 + $0x78] sm:$0xff]  ;;  %v259_v22 = vadd.f32 %v688_v19, %v686_v18 }
  0x14   : > { %v262_v23 = vadd.f32 %v692_v21, %v690_v20 }
  0x19   : > { %245 = vadd.xlane.f32.xlu0 %v244_v15 }
  0x1a   : > { %251 = vadd.xlane.f32.xlu1 %v250_v16 }
  0x1b   : > { %257 = vadd.xlane.f32.xlu2 %v256_v17 }
  0x21   : > { %260 = vadd.xlane.f32.xlu0 %v259_v22 }
  0x22   : > { %263 = vadd.xlane.f32.xlu1 %v262_v23 }
  0x84   : > { %v243_v24 = vpop.xlane.xlu0 %242 }
  0x85   : > { %v249_v25 = vpop.xlane.xlu1 %248  ;;  %v265_v27 = vmul.f32 0.00390625, %v243_v24 }
  0x86   : > { %v255_v26 = vpop.xlane.xlu2 %254  ;;  %v267_v29 = vmul.f32 0.00390625, %v249_v25 }
  0x87   : > { %v289_v33 = vmul.f32 %v273_v28, %v265_v27  ;;  %v269_v40 = vmul.f32 0.00390625, %v255_v26  ;;  %v319_v28 = vld [vmem:[%s833_s2] sm:$0x1] }
  0x88   : > { %v291_v39 = vmul.f32 %v275_v30, %v267_v29 }
  0x89   : > { %v298_v46 = vsel %vm297_vm0, %v289_v33, 0.0  ;;  %v293_v50 = vmul.f32 %v277_v43, %v269_v40  ;;  %v282_v33 = vld [vmem:[%s834_s3 + $0x8] sm:$0xff]  ;;  %v285_v43 = vld [vmem:[%s834_s3 + $0x20] sm:$0xff] }
  0x8a   : > { %v301_v49 = vsel %vm297_vm0, %v291_v39, 0.0 }
  0x8b   : > { %v305_v61 = vsel %vm297_vm0, %v293_v50, 0.0 }
  0x8c   : > { %v246_v32 = vpop.xlane.xlu0 %245 }
  0x8d   : > { %v266_v34 = vmul.f32 0.00390625, %v246_v32  ;;  %v252_v36 = vpop.xlane.xlu1 %251  ;;  %v283_v32 = vld [vmem:[%s834_s3 + $0x10] sm:$0xff] }
  0x8e   : > { %v258_v37 = vpop.xlane.xlu2 %257  ;;  %v268_v38 = vmul.f32 0.00390625, %v252_v36 }
  0x8f   : > { %v290_v41 = vmul.f32 %v274_v31, %v266_v34  ;;  %v270_v42 = vmul.f32 0.00390625, %v258_v37  ;;  %v281_v34 = vld [vmem:[%s834_s3] sm:$0xff] }
  0x90   : > { %v292_v44 = vmul.f32 %v276_v35, %v268_v38 }
  0x91   : > { %v299_v47 = vsel %vm297_vm0, %v290_v41, 0.0  ;;  %v294_v52 = vmul.f32 %v278_v45, %v270_v42  ;;  %v286_v42 = vld [vmem:[%s834_s3 + $0x28] sm:$0xff] }
  0x92   : > { %v300_v48 = vadd.f32 %v299_v47, %v298_v46  ;;  %v303_v51 = vsel %vm297_vm0, %v292_v44, 0.0  ;;  %v284_v44 = vld [vmem:[%s834_s3 + $0x18] sm:$0xff] }
  0x93   : > { %v307_v62 = vsel %vm297_vm0, %v294_v52, 0.0  ;;  %v287_v52 = vld [vmem:[%s834_s3 + $0x30] sm:$0xff] }
  0x94   : > { %v302_v53 = vadd.f32 %v301_v49, %v300_v48  ;;  %v261_v55 = vpop.xlane.xlu0 %260 }
  0x95   : > { %v271_v56 = vmul.f32 0.00390625, %v261_v55  ;;  %v264_v58 = vpop.xlane.xlu1 %263 }
  0x96   : > { %v304_v59 = vadd.f32 %v303_v51, %v302_v53  ;;  %v272_v60 = vmul.f32 0.00390625, %v264_v58  ;;  %v288_v51 = vld [vmem:[%s834_s3 + $0x38] sm:$0xff]  ;;  %v357_v58 = vld [vmem:[%s835_s4 + $0x10] sm:$0xff] }
  0x97   : > { %v295_v63 = vmul.f32 %v279_v54, %v271_v56 }
  0x98   : > { %v306_v3 = vadd.f32 %v305_v61, %v304_v59  ;;  %v296_v7 = vmul.f32 %v280_v57, %v272_v60  ;;  %v603_v57 = vmov 0   ;;  %v356_v59 = vld [vmem:[%s835_s4 + $0x8] sm:$0xff]  ;;  %v355_v60 = vld [vmem:[%s835_s4] sm:$0xff] }
  0x99   : > { %v309_v8 = vsel %vm297_vm0, %v295_v63, 0.0  ;;  %562 = vset.pattern.permute.xlu0 %v603_v57  ;;  %561 = vset.pattern.permute.xlu2 %v603_v57 }
  0x9a   : > { %v308_v15 = vadd.f32 %v307_v62, %v306_v3  ;;  %v311_v16 = vsel %vm297_vm0, %v296_v7, 0.0  ;;  %560 = vset.pattern.permute.xlu1 %v603_v57 }
  0x9c   : > { %v310_v17 = vadd.f32 %v309_v8, %v308_v15 }
  0x9e   : > { %v312_v22 = vadd.f32 %v311_v16, %v310_v17 }
  0xa0   : > { %v313_v23 = vrot.slane %v312_v22, 4 }
  0xa2   : > { %v314_v24 = vadd.f32 %v313_v23, %v312_v22 }
  0xa4   : > { %v315_v25 = vrot.slane %v314_v24, 2 }
  0xa6   : > { %v316_v26 = vadd.f32 %v315_v25, %v314_v24  ;;  %v359_v25 = vld [vmem:[%s835_s4 + $0x20] sm:$0xff] }
  0xa8   : > { %v317_v27 = vrot.slane %v316_v26, 1 }
  0xaa   : > { %v318_v29 = vadd.f32 %v317_v27, %v316_v26  ;;  %v358_v26 = vld [vmem:[%s835_s4 + $0x18] sm:$0xff] }
  0xac   : > { %v320_v30 = vadd.f32 %v319_v28, %v318_v29  ;;  %v360_v28 = vld [vmem:[%s835_s4 + $0x28] sm:$0xff] }
  0xae   : > { %v321_v31 = vmax.f32 %v320_v30, 0.0 }
  0xb0   : > { %v322_v35 = vperm.slane %v321_v31, 0 }
  0xb2   : > { %v325_v36 = vmul.f32 %v322_v35, %v283_v32  ;;  %v324_v37 = vmul.f32 %v322_v35, %v282_v33  ;;  %v323_v38 = vmul.f32 %v322_v35, %v281_v34  ;;  %v328_v45 = vmul.f32 %v322_v35, %v286_v42  ;;  %v361_v42 = vld [vmem:[%s835_s4 + $0x30] sm:$0xff] }
  0xb3   : > { %v327_v46 = vmul.f32 %v322_v35, %v285_v43  ;;  %v326_v47 = vmul.f32 %v322_v35, %v284_v44  ;;  %v330_v53 = vmul.f32 %v322_v35, %v288_v51  ;;  %v329_v54 = vmul.f32 %v322_v35, %v287_v52 }
  0xb4   : > { %v337_v39 = vsel %vm297_vm0, %v325_v36, 0.0  ;;  %v334_v40 = vsel %vm297_vm0, %v324_v37, 0.0  ;;  %v331_v41 = vsel %vm297_vm0, %v323_v38, 0.0  ;;  %v346_v48 = vsel %vm297_vm0, %v328_v45, 0.0 }
  0xb5   : > { %338 = vadd.xlane.f32.xlu1 %v337_v39  ;;  %335 = vadd.xlane.f32.xlu0 %v334_v40  ;;  %v343_v49 = vsel %vm297_vm0, %v327_v46, 0.0  ;;  %v340_v50 = vsel %vm297_vm0, %v326_v47, 0.0  ;;  %v352_v55 = vsel %vm297_vm0, %v330_v53, 0.0  ;;  %v349_v56 = vsel %vm297_vm0, %v329_v54, 0.0  ;;  %v362_v46 = vld [vmem:[%s835_s4 + $0x38] sm:$0xff] }
  0xb6   : > { %332 = vadd.xlane.f32.xlu2 %v331_v41 }
  0xbd   : > { %347 = vadd.xlane.f32.xlu1 %v346_v48  ;;  %344 = vadd.xlane.f32.xlu0 %v343_v49 }
  0xbe   : > { %341 = vadd.xlane.f32.xlu2 %v340_v50 }
  0xc5   : > { %353 = vadd.xlane.f32.xlu0 %v352_v55 }
  0xc6   : > { %350 = vadd.xlane.f32.xlu2 %v349_v56 }
 0x128   : > { %v339_v61 = vpop.xlane.xlu1 %338  ;;  %v336_v62 = vpop.xlane.xlu0 %335 }
 0x129   : > { %v365_v63 = vadd.f32 %v357_v58, %v339_v61  ;;  %v364_v3 = vadd.f32 %v356_v59, %v336_v62  ;;  %v333_v7 = vpop.xlane.xlu2 %332 }
 0x12a   : > { %v363_v8 = vadd.f32 %v355_v60, %v333_v7 }
 0x12b   : > { %v373_v15 = vsub.f32 0.0, %v365_v63  ;;  %v372_v16 = vsub.f32 0.0, %v364_v3 }
 0x12c   : > { %v371_v17 = vsub.f32 0.0, %v363_v8 }
 0x12d   : > { %v383_v22 = vmul.f32 1.442695, %v373_v15  ;;  %v381_v23 = vmul.f32 1.442695, %v372_v16 }
 0x12e   : > { %v379_v24 = vmul.f32 1.442695, %v371_v17 }
 0x12f   : > { %563 = vpow2.f32 %v383_v22 }
 0x130   : > { %565 = vpow2.f32 %v381_v23  ;;  %v345_v27 = vpop.xlane.xlu0 %344  ;;  %v348_v29 = vpop.xlane.xlu1 %347 }
 0x131   : > { %567 = vpow2.f32 %v379_v24  ;;  %v367_v30 = vadd.f32 %v359_v25, %v345_v27  ;;  %v342_v31 = vpop.xlane.xlu2 %341  ;;  %v368_v34 = vadd.f32 %v360_v28, %v348_v29 }
 0x132   : > { %v366_v32 = vadd.f32 %v358_v26, %v342_v31 }
 0x133   : > { %v375_v33 = vsub.f32 0.0, %v367_v30  ;;  %v376_v44 = vsub.f32 0.0, %v368_v34 }
 0x134   : > { %v374_v35 = vsub.f32 0.0, %v366_v32 }
 0x135   : > { %v564_v36 = vpop.eup %563  ;;  %v387_v41 = vmul.f32 1.442695, %v375_v33  ;;  %v389_v50 = vmul.f32 1.442695, %v376_v44 }
 0x136   : > { %v566_v37 = vpop.eup %565  ;;  %v397_v38 = vadd.f32 1.0, %v564_v36  ;;  %v385_v45 = vmul.f32 1.442695, %v374_v35 }
 0x137   : > { %v568_v39 = vpop.eup %567  ;;  %v396_v40 = vadd.f32 1.0, %v566_v37 }
 0x138   : > { %569 = vrcp.f32 %v397_v38  ;;  %v395_v43 = vadd.f32 1.0, %v568_v39  ;;  %v354_v47 = vpop.xlane.xlu0 %353 }
 0x139   : > { %571 = vrcp.f32 %v396_v40  ;;  %v351_v48 = vpop.xlane.xlu2 %350  ;;  %v370_v51 = vadd.f32 %v362_v46, %v354_v47 }
 0x13a   : > { %573 = vrcp.f32 %v395_v43  ;;  %v369_v49 = vadd.f32 %v361_v42, %v351_v48 }
 0x13b   : > { %575 = vpow2.f32 %v387_v41  ;;  %v378_v57 = vsub.f32 0.0, %v370_v51 }
 0x13c   : > { %577 = vpow2.f32 %v385_v45  ;;  %v377_v52 = vsub.f32 0.0, %v369_v49 }
 0x13d   : > { %579 = vpow2.f32 %v389_v50  ;;  %v393_v62 = vmul.f32 1.442695, %v378_v57 }
 0x13e   : > { %v570_v53 = vpop.eup %569  ;;  %v391_v54 = vmul.f32 1.442695, %v377_v52 }
 0x13f   : > { %v572_v55 = vpop.eup %571  ;;  %423 = vperm.xlu0 %562, %v570_v53  }
 0x140   : > { %v574_v56 = vpop.eup %573  ;;  %418 = vperm.xlu2 %561, %v572_v55   ;;  %581 = vpow2.f32 %v391_v54 }
 0x141   : > { %v576_v58 = vpop.eup %575  ;;  %413 = vperm.xlu1 %560, %v574_v56  }
 0x142   : > { %v578_v59 = vpop.eup %577  ;;  %v399_v60 = vadd.f32 1.0, %v576_v58 }
 0x143   : > { %v398_v61 = vadd.f32 1.0, %v578_v59  ;;  %v580_v63 = vpop.eup %579 }
 0x144   : > { %583 = vrcp.f32 %v399_v60  ;;  %v400_v8 = vadd.f32 1.0, %v580_v63 }
 0x145   : > { %585 = vrcp.f32 %v398_v61 }
 0x146   : > { %v582_v3 = vpop.eup %581  ;;  %587 = vpow2.f32 %v393_v62 }
 0x147   : > { %v401_v7 = vadd.f32 1.0, %v582_v3 }
 0x149   : > { %589 = vrcp.f32 %v401_v7 }
 0x14a   : > { %v584_v15 = vpop.eup %583  ;;  %591 = vrcp.f32 %v400_v8 }
 0x14b   : > { %v586_v16 = vpop.eup %585  ;;  %433 = vperm.xlu1 %560, %v584_v15  }
 0x14c   : > { %428 = vperm.xlu2 %561, %v586_v16   ;;  %v588_v17 = vpop.eup %587 }
 0x14d   : > { %v402_v23 = vadd.f32 1.0, %v588_v17 }
 0x14f   : > { %v590_v22 = vpop.eup %589  ;;  %593 = vrcp.f32 %v402_v23 }
 0x150   : > { %v592_v24 = vpop.eup %591 }
 0x153   : > { %443 = vperm.xlu1 %560, %v590_v22  }
 0x154   : > { %438 = vperm.xlu2 %561, %v592_v24  }
 0x155   : > { %v594_v25 = vpop.eup %593 }
 0x15c   : > { %448 = vperm.xlu2 %561, %v594_v25  }
 0x19a   : > { %v419_v26 = vpop.permute.xlu2 %418 }
 0x19b   : > { %v453_v27 = vmul.f32 %v419_v26, %v668_v9  ;;  %v454_v28 = vmul.f32 %v419_v26, %v670_v10 }
 0x19d   : > { %469 = vst [vmem:[%s794_s7 + $0x10] sm:$0xff] %v453_v27 }
 0x19e   : > { %470 = vst [vmem:[%s794_s7 + $0x18] sm:$0xff] %v454_v28 }
 0x1a6   : > { %v429_v29 = vpop.permute.xlu2 %428 }
 0x1a7   : > { %v457_v30 = vmul.f32 %v429_v29, %v672_v11  ;;  %v458_v31 = vmul.f32 %v429_v29, %v674_v12 }
 0x1a9   : > { %473 = vst [vmem:[%s794_s7 + $0x30] sm:$0xff] %v457_v30 }
 0x1aa   : > { %474 = vst [vmem:[%s794_s7 + $0x38] sm:$0xff] %v458_v31 }
 0x1ae   : > { %v439_v32 = vpop.permute.xlu2 %438 }
 0x1af   : > { %v461_v33 = vmul.f32 %v439_v32, %v676_v13  ;;  %v462_v9 = vmul.f32 %v439_v32, %v678_v14 }
 0x1b1   : > { %477 = vst [vmem:[%s794_s7 + $0x50] sm:$0xff] %v461_v33  ;;  %v424_v10 = vpop.permute.xlu0 %423 }
 0x1b2   : > { %478 = vst [vmem:[%s794_s7 + $0x58] sm:$0xff] %v462_v9  ;;  %v455_v34 = vmul.f32 %v424_v10, %v654_v2  ;;  %v456_v11 = vmul.f32 %v424_v10, %v658_v4 }
 0x1b3   : > { %v414_v12 = vpop.permute.xlu1 %413 }
 0x1b4   : > { %471 = vst [vmem:[%s794_s7 + $0x20] sm:$0xff] %v455_v34  ;;  %v451_v35 = vmul.f32 %v414_v12, %v650_v0  ;;  %v452_v36 = vmul.f32 %v414_v12, %v652_v1 }
 0x1b5   : > { %472 = vst [vmem:[%s794_s7 + $0x28] sm:$0xff] %v456_v11 }
 0x1b6   : > { %467 = vst [vmem:[%s794_s7] sm:$0xff] %v451_v35  ;;  %v449_v13 = vpop.permute.xlu2 %448 }
 0x1b7   : > { %468 = vst [vmem:[%s794_s7 + $0x8] sm:$0xff] %v452_v36  ;;  %v465_v14 = vmul.f32 %v449_v13, %v690_v20  ;;  %v466_v2 = vmul.f32 %v449_v13, %v692_v21 }
 0x1b9   : > { %481 = vst [vmem:[%s794_s7 + $0x70] sm:$0xff] %v465_v14 }
 0x1ba   : > { %482 = vst [vmem:[%s794_s7 + $0x78] sm:$0xff] %v466_v2 }
 0x1bd   : > { %v434_v4 = vpop.permute.xlu1 %433 }
 0x1be   : > { %v459_v37 = vmul.f32 %v434_v4, %v660_v5  ;;  %v460_v38 = vmul.f32 %v434_v4, %v662_v6 }
 0x1c0   : > { %475 = vst [vmem:[%s794_s7 + $0x40] sm:$0xff] %v459_v37 }
 0x1c1   : > { %476 = vst [vmem:[%s794_s7 + $0x48] sm:$0xff] %v460_v38 }
 0x1c5   : > { %v444_v0 = vpop.permute.xlu1 %443 }
 0x1c6   : > { %v463_v1 = vmul.f32 %v444_v0, %v686_v18  ;;  %v464_v39 = vmul.f32 %v444_v0, %v688_v19 }
 0x1c8   : > { %479 = vst [vmem:[%s794_s7 + $0x60] sm:$0xff] %v463_v1 }
 0x1c9   : > { %480 = vst [vmem:[%s794_s7 + $0x68] sm:$0xff] %v464_v39 }
 0x1ca PF: > { %s15_s18 = sadd.s32 1, %s601_s18  }
 0x1cb   : > { %p12_p4 = scmp.ge.s32.totalorder %s15_s18, 4  }
 0x1cd   :  { %14 = sbr.rel (!%p12_p4) target bundleno = 1 (0x1), region = 70 }

</bundles_post_ra>
